<compile_context>
chip_gen: v6e
topology: v6e:2x2x1
jax: 0.10.0
libtpu: 0.0.40
codegen_flags: <defaults>
</compile_context>

<pallas_src>
import functools

import jax
import jax.numpy as jnp
from jax import lax
from jax.experimental import pallas as pl
from jax.experimental.pallas import tpu as pltpu


def _dmon_kernel(x_ref, adjt_ref, dinv_ref,
                 w1_ref, b1_ref, w2_ref, b2_ref, ws_ref, bs_ref,
                 s_ref, losses_ref, *, num_clusters):
    f32 = jnp.float32
    bf16 = jnp.bfloat16

    adjt = adjt_ref[...]          # (N, N) bf16, adjt[dst, src]
    dinv = dinv_ref[...]          # (N, 1) f32
    n = adjt.shape[0]

    # GCNConv: relu(A_hat (h W) + b), A_hat = D^-1/2 (adjT + I) D^-1/2, computed
    # without materialising A_hat.  Only the (N,N)x(N,H) contraction is bf16.
    def gcn(h, w_ref, b_ref):
        zw = jnp.dot(h, w_ref[...], preferred_element_type=f32)          # (N, H)
        zs = dinv * zw                                                    # D^-1/2 (h W)
        agg = jnp.dot(adjt, zs.astype(bf16), preferred_element_type=f32)  # adjT @ zs
        return jnp.maximum(dinv * (agg + zs) + b_ref[...], 0.0)

    h1 = gcn(x_ref[...], w1_ref, b1_ref)
    h2 = gcn(h1, w2_ref, b2_ref)

    # ---- DMoN cluster assignment: softmax(h2 Ws + bs), dropout = 0 ----
    # Cluster dim padded to 128 lanes; padded columns carry bias -1e30 so their
    # softmax probability is exactly 0 (lane-dense, single unmasked store).
    logits = jnp.dot(h2, ws_ref[...], preferred_element_type=f32) + bs_ref[...]
    logits = logits - jnp.max(logits, axis=-1, keepdims=True)
    e = jnp.exp(logits)
    s = e / jnp.sum(e, axis=-1, keepdims=True)           # (N, Cp) f32
    s_ref[...] = s

    # ---- spectral (modularity) loss: mirrors PyG DMoNPooling ----
    #   degrees  = 2 * adj.sum(axis=-1)          (PyG doubles the node degrees)
    #   m        = degrees.sum() / 2             ( = adj.sum() )
    #   spectral = -tr(S^T adj S - (S^T deg)(deg^T S)/(2m)) / (2m)
    # Trace-only identities using adjT = adj^T (the single resident array):
    #   tr(S^T adj S) = sum(S * (adjT @ S))
    #   deg^T S       = column sums of (adjT @ S)     (deg = row sums of adj)
    #   adj.sum()     = sum(deg^T S)                  (softmax rows sum to 1)
    adjt_s = jnp.dot(adjt, s.astype(bf16), preferred_element_type=f32)    # (N, Cp)
    trace_pool = jnp.sum(s * adjt_s, axis=(0, 1), keepdims=True)          # (1, 1)
    deg2_s = 2.0 * jnp.sum(adjt_s, axis=0, keepdims=True)                 # (1, Cp) = (2d)^T S
    m = 0.5 * jnp.sum(deg2_s, axis=1, keepdims=True)                      # (1, 1) = adj.sum()
    m = jnp.where(m > 0.0, m, 1.0)     # zero-edge guard (torch would return NaN)
    norm_tr = jnp.sum(deg2_s * deg2_s, axis=1, keepdims=True) / (2.0 * m)
    spectral = -(trace_pool - norm_tr) / (2.0 * m)

    # ---- cluster (collapse) loss: ||sum_i S_i|| * sqrt(C) / N - 1 ----
    cs = jnp.sum(s, axis=0, keepdims=True)                                # (1, Cp)
    cs_norm = jnp.sqrt(jnp.sum(cs * cs, axis=1, keepdims=True))           # (1, 1)
    cluster = cs_norm * (float(num_clusters) ** 0.5 / float(n)) - 1.0

    # single (1, 2) store: [spectral, cluster]
    lane = lax.broadcasted_iota(jnp.int32, (1, 2), 1)
    losses_ref[...] = jnp.where(lane == 0, spectral, cluster)


def dmon_forward(x, edge_index, edge_weight, params):
    """Returns (cluster_assignment (1,N,C), loss, 100*spectral, 100*cluster)."""
    x = x.astype(jnp.float32)
    edge_weight = edge_weight.astype(jnp.float32)
    N = x.shape[0]
    src, dst = edge_index[0], edge_index[1]

    # --- glue (JAX): sparse edge list -> ONE dense transposed adjacency + dinv ---
    # TODO(synk): for very large N a CSR + scalar-prefetch in-kernel build would
    # avoid this dense O(N^2) scatter on the XLA side.
    adjt = jnp.zeros((N, N), jnp.float32).at[dst, src].add(edge_weight)
    adjt = adjt.astype(jnp.bfloat16)                       # bf16 over HBM / in VMEM
    # gcn_norm degree: aggregate edge weight at dst, self loop weight 1 (deg > 0).
    deg = jnp.zeros((N,), jnp.float32).at[dst].add(edge_weight) + 1.0
    dinv = lax.rsqrt(deg).reshape(N, 1)

    w1, b1, w2, b2, ws, bs = (p.astype(jnp.float32) for p in params)
    H = w1.shape[1]
    C = ws.shape[1]
    Cp = ((C + 127) // 128) * 128        # lane-dense cluster dim (>= 128)

    # Pad the assignment head so the softmax / s output are lane dense.
    ws_p = jnp.zeros((H, Cp), jnp.float32).at[:, :C].set(ws)
    bs_p = jnp.full((1, Cp), -1e30, jnp.float32).at[0, :C].set(bs)

    # Generation-aware scoped-VMEM limit: ~80% of physical capacity
    # (v5e/v6e 128 MiB, v7x 64 MiB) leaves headroom for compiler scratch.
    try:
        vmem_cap = int(pltpu.get_tpu_info().vmem_capacity_bytes)
    except Exception:
        vmem_cap = 64 * 1024 * 1024      # conservative (safe on every generation)
    vmem_limit = min(int(vmem_cap * 0.8), 110 * 1024 * 1024)

    vmem = functools.partial(pl.BlockSpec, memory_space=pltpu.MemorySpace.VMEM)
    out_shapes = (
        jax.ShapeDtypeStruct((N, Cp), jnp.float32),   # s (lane padded)
        jax.ShapeDtypeStruct((1, 2), jnp.float32),    # [spectral, cluster]
    )
    s_pad, losses = pl.pallas_call(
        functools.partial(_dmon_kernel, num_clusters=C),
        out_shape=out_shapes,
        in_specs=[vmem()] * 9,
        out_specs=(vmem(), vmem()),
        compiler_params=pltpu.CompilerParams(vmem_limit_bytes=vmem_limit),
    )(x, adjt, dinv, w1, b1.reshape(1, -1), w2, b2.reshape(1, -1), ws_p, bs_p)

    s = s_pad[:, :C]
    spectral = losses[0, 0]
    cluster = losses[0, 1]
    loss = 100.0 * (spectral + cluster)
    return s[None], loss, 100.0 * spectral, 100.0 * cluster


def init_params(key, in_channels, hidden_channels, clusters):
    k1, k2, k3 = jax.random.split(key, 3)
    w1 = jax.random.normal(k1, (in_channels, hidden_channels), jnp.float32) \
        * (1.0 / jnp.sqrt(in_channels))
    b1 = jnp.zeros((hidden_channels,), jnp.float32)
    w2 = jax.random.normal(k2, (hidden_channels, hidden_channels), jnp.float32) \
        * (1.0 / jnp.sqrt(hidden_channels))
    b2 = jnp.zeros((hidden_channels,), jnp.float32)
    ws = jax.random.normal(k3, (hidden_channels, clusters), jnp.float32) \
        * (1.0 / jnp.sqrt(hidden_channels))
    bs = jnp.zeros((clusters,), jnp.float32)
    return (w1, b1, w2, b2, ws, bs)


if __name__ == "__main__":
    N, F, H, C = 32, 16, 32, 4   # nodes, in_channels, hidden_channels, clusters

    key = jax.random.PRNGKey(0)
    kx, kw, kp = jax.random.split(key, 3)

    # deterministic small graph: bidirectional ring over N nodes
    i = jnp.arange(N, dtype=jnp.int32)
    src = jnp.concatenate([i, (i + 1) % N])
    dst = jnp.concatenate([(i + 1) % N, i])
    edge_index = jnp.stack([src, dst])                        # (2, 2N)
    edge_attributes = jax.random.uniform(kw, (2 * N,), jnp.float32, 0.5, 1.5)

    x = jax.random.normal(kx, (N, F), jnp.float32)
    params = init_params(kp, F, H, C)

    cluster_assignment, loss, spec100, clus100 = dmon_forward(
        x, edge_index, edge_attributes, params)
    jax.block_until_ready((cluster_assignment, loss, spec100, clus100))

    assert cluster_assignment.shape == (1, N, C)
    assert bool(jnp.isfinite(loss))
    assert bool(jnp.isfinite(spec100)) and bool(jnp.isfinite(clus100))
    # softmax rows (sliced to the real clusters) must sum to 1
    assert bool(jnp.allclose(jnp.sum(cluster_assignment, axis=-1), 1.0, atol=1e-5))
    print("KERNEL_OK")
</pallas_src>

<mosaic_0001>
module attributes {stable_mosaic.version = 11 : i64} {
  func.func @_dmon_kernel(%arg0: memref<32x16xf32, #tpu.memory_space<vmem>>, %arg1: memref<32x32xbf16, #tpu.memory_space<vmem>>, %arg2: memref<32x1xf32, #tpu.memory_space<vmem>>, %arg3: memref<16x32xf32, #tpu.memory_space<vmem>>, %arg4: memref<1x32xf32, #tpu.memory_space<vmem>>, %arg5: memref<32x32xf32, #tpu.memory_space<vmem>>, %arg6: memref<1x32xf32, #tpu.memory_space<vmem>>, %arg7: memref<32x128xf32, #tpu.memory_space<vmem>>, %arg8: memref<1x128xf32, #tpu.memory_space<vmem>>, %arg9: memref<32x128xf32, #tpu.memory_space<vmem>>, %arg10: memref<1x2xf32, #tpu.memory_space<vmem>>) attributes {dimension_semantics = [], scalar_prefetch = 0 : i64, scratch_operands = 0 : i64, tpu.core_type = #tpu.core_type<tc>} {
    %c0 = arith.constant 0 : index
    %c0_0 = arith.constant 0 : index
    %0 = vector.load %arg1[%c0, %c0_0] : memref<32x32xbf16, #tpu.memory_space<vmem>>, vector<32x32xbf16>
    %c0_1 = arith.constant 0 : index
    %c0_2 = arith.constant 0 : index
    %1 = vector.load %arg2[%c0_1, %c0_2] : memref<32x1xf32, #tpu.memory_space<vmem>>, vector<32x1xf32>
    %c0_3 = arith.constant 0 : index
    %c0_4 = arith.constant 0 : index
    %2 = vector.load %arg0[%c0_3, %c0_4] : memref<32x16xf32, #tpu.memory_space<vmem>>, vector<32x16xf32>
    %c0_5 = arith.constant 0 : index
    %c0_6 = arith.constant 0 : index
    %3 = vector.load %arg3[%c0_5, %c0_6] : memref<16x32xf32, #tpu.memory_space<vmem>>, vector<16x32xf32>
    %cst = arith.constant dense<0.000000e+00> : vector<32x32xf32>
    %4 = tpu.matmul %2, %3, %cst {dimension_numbers = #tpu.dot_dimension_numbers<[1], [0], [0], [1], [0, 0, 1, 1], [], []>} : vector<32x16xf32>, vector<16x32xf32>, vector<32x32xf32> -> vector<32x32xf32>
    %5 = vector.broadcast %1 : vector<32x1xf32> to vector<32x32xf32>
    %6 = arith.mulf %5, %4 : vector<32x32xf32>
    %7 = arith.truncf %6 : vector<32x32xf32> to vector<32x32xbf16>
    %cst_7 = arith.constant dense<0.000000e+00> : vector<32x32xf32>
    %8 = tpu.matmul %0, %7, %cst_7 {dimension_numbers = #tpu.dot_dimension_numbers<[1], [0], [0], [1], [0, 0, 1, 1], [], []>} : vector<32x32xbf16>, vector<32x32xbf16>, vector<32x32xf32> -> vector<32x32xf32>
    %9 = arith.addf %8, %6 : vector<32x32xf32>
    %10 = vector.broadcast %1 : vector<32x1xf32> to vector<32x32xf32>
    %11 = arith.mulf %10, %9 : vector<32x32xf32>
    %c0_8 = arith.constant 0 : index
    %c0_9 = arith.constant 0 : index
    %12 = vector.load %arg4[%c0_8, %c0_9] : memref<1x32xf32, #tpu.memory_space<vmem>>, vector<1x32xf32>
    %13 = vector.broadcast %12 : vector<1x32xf32> to vector<32x32xf32>
    %14 = arith.addf %11, %13 : vector<32x32xf32>
    %cst_10 = arith.constant 0.000000e+00 : f32
    %15 = vector.broadcast %cst_10 : f32 to vector<32x32xf32>
    %16 = arith.maximumf %14, %15 : vector<32x32xf32>
    %c0_11 = arith.constant 0 : index
    %c0_12 = arith.constant 0 : index
    %17 = vector.load %arg5[%c0_11, %c0_12] : memref<32x32xf32, #tpu.memory_space<vmem>>, vector<32x32xf32>
    %cst_13 = arith.constant dense<0.000000e+00> : vector<32x32xf32>
    %18 = tpu.matmul %16, %17, %cst_13 {dimension_numbers = #tpu.dot_dimension_numbers<[1], [0], [0], [1], [0, 0, 1, 1], [], []>} : vector<32x32xf32>, vector<32x32xf32>, vector<32x32xf32> -> vector<32x32xf32>
    %19 = vector.broadcast %1 : vector<32x1xf32> to vector<32x32xf32>
    %20 = arith.mulf %19, %18 : vector<32x32xf32>
    %21 = arith.truncf %20 : vector<32x32xf32> to vector<32x32xbf16>
    %cst_14 = arith.constant dense<0.000000e+00> : vector<32x32xf32>
    %22 = tpu.matmul %0, %21, %cst_14 {dimension_numbers = #tpu.dot_dimension_numbers<[1], [0], [0], [1], [0, 0, 1, 1], [], []>} : vector<32x32xbf16>, vector<32x32xbf16>, vector<32x32xf32> -> vector<32x32xf32>
    %23 = arith.addf %22, %20 : vector<32x32xf32>
    %24 = vector.broadcast %1 : vector<32x1xf32> to vector<32x32xf32>
    %25 = arith.mulf %24, %23 : vector<32x32xf32>
    %c0_15 = arith.constant 0 : index
    %c0_16 = arith.constant 0 : index
    %26 = vector.load %arg6[%c0_15, %c0_16] : memref<1x32xf32, #tpu.memory_space<vmem>>, vector<1x32xf32>
    %27 = vector.broadcast %26 : vector<1x32xf32> to vector<32x32xf32>
    %28 = arith.addf %25, %27 : vector<32x32xf32>
    %cst_17 = arith.constant 0.000000e+00 : f32
    %29 = vector.broadcast %cst_17 : f32 to vector<32x32xf32>
    %30 = arith.maximumf %28, %29 : vector<32x32xf32>
    %c0_18 = arith.constant 0 : index
    %c0_19 = arith.constant 0 : index
    %31 = vector.load %arg7[%c0_18, %c0_19] : memref<32x128xf32, #tpu.memory_space<vmem>>, vector<32x128xf32>
    %cst_20 = arith.constant dense<0.000000e+00> : vector<32x128xf32>
    %32 = tpu.matmul %30, %31, %cst_20 {dimension_numbers = #tpu.dot_dimension_numbers<[1], [0], [0], [1], [0, 0, 1, 1], [], []>} : vector<32x32xf32>, vector<32x128xf32>, vector<32x128xf32> -> vector<32x128xf32>
    %c0_21 = arith.constant 0 : index
    %c0_22 = arith.constant 0 : index
    %33 = vector.load %arg8[%c0_21, %c0_22] : memref<1x128xf32, #tpu.memory_space<vmem>>, vector<1x128xf32>
    %34 = vector.broadcast %33 : vector<1x128xf32> to vector<32x128xf32>
    %35 = arith.addf %32, %34 : vector<32x128xf32>
    %cst_23 = arith.constant dense<0xFF800000> : vector<32xf32>
    %36 = vector.multi_reduction <maximumf>, %35, %cst_23 [1] : vector<32x128xf32> to vector<32xf32>
    %37 = vector.shape_cast %36 : vector<32xf32> to vector<32x1xf32>
    %38 = vector.broadcast %37 : vector<32x1xf32> to vector<32x128xf32>
    %39 = arith.subf %35, %38 : vector<32x128xf32>
    %40 = math.exp %39 : vector<32x128xf32>
    %cst_24 = arith.constant dense<0.000000e+00> : vector<32xf32>
    %41 = vector.multi_reduction <add>, %40, %cst_24 [1] : vector<32x128xf32> to vector<32xf32>
    %42 = vector.shape_cast %41 : vector<32xf32> to vector<32x1xf32>
    %43 = vector.broadcast %42 : vector<32x1xf32> to vector<32x128xf32>
    %44 = arith.divf %40, %43 : vector<32x128xf32>
    %c0_25 = arith.constant 0 : index
    %c0_26 = arith.constant 0 : index
    %45 = vector.load %arg9[%c0_25, %c0_26] : memref<32x128xf32, #tpu.memory_space<vmem>>, vector<32x128xf32>
    tpu.vector_store %arg9[%c0_25, %c0_26], %44 {strides = array<i32>} : memref<32x128xf32, #tpu.memory_space<vmem>>, vector<32x128xf32>,
    %46 = arith.truncf %44 : vector<32x128xf32> to vector<32x128xbf16>
    %cst_27 = arith.constant dense<0.000000e+00> : vector<32x128xf32>
    %47 = tpu.matmul %0, %46, %cst_27 {dimension_numbers = #tpu.dot_dimension_numbers<[1], [0], [0], [1], [0, 0, 1, 1], [], []>} : vector<32x32xbf16>, vector<32x128xbf16>, vector<32x128xf32> -> vector<32x128xf32>
    %48 = arith.mulf %44, %47 : vector<32x128xf32>
    %49 = vector.shape_cast %48 : vector<32x128xf32> to vector<1x32x128xf32>
    %cst_28 = arith.constant dense<0.000000e+00> : vector<1xf32>
    %50 = vector.multi_reduction <add>, %49, %cst_28 [1, 2] : vector<1x32x128xf32> to vector<1xf32>
    %51 = vector.shape_cast %50 : vector<1xf32> to vector<1x1x1xf32>
    %52 = vector.extract %51[0, 0, 0] : f32 from vector<1x1x1xf32>
    %53 = vector.broadcast %52 : f32 to vector<1x1xf32>
    %cst_29 = arith.constant dense<0.000000e+00> : vector<128xf32>
    %54 = vector.multi_reduction <add>, %47, %cst_29 [0] : vector<32x128xf32> to vector<128xf32>
    %55 = vector.shape_cast %54 : vector<128xf32> to vector<1x128xf32>
    %cst_30 = arith.constant 2.000000e+00 : f32
    %56 = vector.broadcast %cst_30 : f32 to vector<1x128xf32>
    %57 = arith.mulf %56, %55 : vector<1x128xf32>
    %cst_31 = arith.constant dense<0.000000e+00> : vector<1xf32>
    %58 = vector.multi_reduction <add>, %57, %cst_31 [1] : vector<1x128xf32> to vector<1xf32>
    %59 = vector.shape_cast %58 : vector<1xf32> to vector<1x1xf32>
    %cst_32 = arith.constant 5.000000e-01 : f32
    %60 = vector.broadcast %cst_32 : f32 to vector<1x1xf32>
    %61 = arith.mulf %60, %59 : vector<1x1xf32>
    %cst_33 = arith.constant 0.000000e+00 : f32
    %62 = vector.broadcast %cst_33 : f32 to vector<1x1xf32>
    %63 = arith.cmpf ogt, %61, %62 : vector<1x1xf32>
    %cst_34 = arith.constant 1.000000e+00 : f32
    %64 = vector.broadcast %cst_34 : f32 to vector<1x1xf32>
    %65 = arith.select %63, %61, %64 : vector<1x1xi1>, vector<1x1xf32>
    %66 = arith.mulf %57, %57 : vector<1x128xf32>
    %cst_35 = arith.constant dense<0.000000e+00> : vector<1xf32>
    %67 = vector.multi_reduction <add>, %66, %cst_35 [1] : vector<1x128xf32> to vector<1xf32>
    %68 = vector.shape_cast %67 : vector<1xf32> to vector<1x1xf32>
    %cst_36 = arith.constant 2.000000e+00 : f32
    %69 = vector.broadcast %cst_36 : f32 to vector<1x1xf32>
    %70 = arith.mulf %69, %65 : vector<1x1xf32>
    %71 = arith.divf %68, %70 : vector<1x1xf32>
    %72 = arith.subf %53, %71 : vector<1x1xf32>
    %cst_37 = arith.constant 0.000000e+00 : f32
    %73 = vector.broadcast %cst_37 : f32 to vector<1x1xf32>
    %74 = arith.subf %73, %72 : vector<1x1xf32>
    %cst_38 = arith.constant 2.000000e+00 : f32
    %75 = vector.broadcast %cst_38 : f32 to vector<1x1xf32>
    %76 = arith.mulf %75, %65 : vector<1x1xf32>
    %77 = arith.divf %74, %76 : vector<1x1xf32>
    %cst_39 = arith.constant dense<0.000000e+00> : vector<128xf32>
    %78 = vector.multi_reduction <add>, %44, %cst_39 [0] : vector<32x128xf32> to vector<128xf32>
    %79 = vector.shape_cast %78 : vector<128xf32> to vector<1x128xf32>
    %80 = arith.mulf %79, %79 : vector<1x128xf32>
    %cst_40 = arith.constant dense<0.000000e+00> : vector<1xf32>
    %81 = vector.multi_reduction <add>, %80, %cst_40 [1] : vector<1x128xf32> to vector<1xf32>
    %82 = vector.shape_cast %81 : vector<1xf32> to vector<1x1xf32>
    %83 = math.sqrt %82 : vector<1x1xf32>
    %cst_41 = arith.constant 6.250000e-02 : f32
    %84 = vector.broadcast %cst_41 : f32 to vector<1x1xf32>
    %85 = arith.mulf %83, %84 : vector<1x1xf32>
    %cst_42 = arith.constant 1.000000e+00 : f32
    %86 = vector.broadcast %cst_42 : f32 to vector<1x1xf32>
    %87 = arith.subf %85, %86 : vector<1x1xf32>
    %88 = tpu.iota {dimensions = array<i32: 1>} : vector<1x2xi32>
    %c0_i32 = arith.constant 0 : i32
    %89 = vector.broadcast %c0_i32 : i32 to vector<1x2xi32>
    %90 = arith.cmpi eq, %88, %89 : vector<1x2xi32>
    %91 = vector.shape_cast %77 : vector<1x1xf32> to vector<1x1xf32>
    %92 = vector.broadcast %91 : vector<1x1xf32> to vector<1x2xf32>
    %93 = vector.shape_cast %87 : vector<1x1xf32> to vector<1x1xf32>
    %94 = vector.broadcast %93 : vector<1x1xf32> to vector<1x2xf32>
    %95 = arith.select %90, %92, %94 : vector<1x2xi1>, vector<1x2xf32>
    %c0_43 = arith.constant 0 : index
    %c0_44 = arith.constant 0 : index
    %96 = vector.load %arg10[%c0_43, %c0_44] : memref<1x2xf32, #tpu.memory_space<vmem>>, vector<1x2xf32>
    tpu.vector_store %arg10[%c0_43, %c0_44], %95 {strides = array<i32>} : memref<1x2xf32, #tpu.memory_space<vmem>>, vector<1x2xf32>,
    return
  }
}

</mosaic_0001>

<bundles_post_ra>
// kernel: tpu_custom_call.1
= control target key start
LH: loop header
LB: loop body
LE: loop exit
PB: predicated region body
PF: predicated region fallthrough
CT: control target
= control target key end

     0   :  { %16 = vsyncpa [#allocation3], 0  ;;  %s1156_s0 = inlined_call_operand.vmem [shape: f32[32,16], index: 0, kind: input, shape index: {}]   ;;  %s1157_s1 = inlined_call_operand.vmem [shape: bf16[32,32], index: 1, kind: input, shape index: {}]   ;;  %s1158_s2 = inlined_call_operand.vmem [shape: f32[32,1], index: 2, kind: input, shape index: {}]   ;;  %s1159_s3 = inlined_call_operand.hbm [shape: f32[16,32], index: 3, kind: input, shape index: {}]   ;;  %s1160_s4 = inlined_call_operand.vmem [shape: f32[1,32], index: 4, kind: input, shape index: {}]   ;;  %s1161_s5 = inlined_call_operand.vmem [shape: f32[32,32], index: 5, kind: input, shape index: {}]   ;;  %s1162_s6 = inlined_call_operand.vmem [shape: f32[1,32], index: 6, kind: input, shape index: {}]   ;;  %s1163_s7 = inlined_call_operand.vmem [shape: f32[32,128], index: 7, kind: input, shape index: {}]   ;;  %s1164_s8 = inlined_call_operand.vmem [shape: f32[1,128], index: 8, kind: input, shape index: {}]   ;;  %s1165_s9 = inlined_call_operand.hbm [shape: f32[32,128], index: 9, kind: output, shape index: {0}]   ;;  %s1166_s10 = inlined_call_operand.hbm [shape: f32[1,2], index: 10, kind: output, shape index: {1}]  }
   0x1   :  { %17 = vsyncpa [#allocation4], 0 }
   0x2   :  { %18 = vsyncpa [#allocation7], 0  ;;  %s965_s13 = smov [#allocation2]  }
   0x3   :  { %s30_s14 = sshll.u32 %s965_s13, 4  ;;  %s31_s14 = int_to_ptr.vmem [resolvable:$true] %s30_s14 }
   0x4   :  { %s907_s15 = scalar_lea.vmem %s31_s14, 256  ;;  %p912_p1 = scmp.lt.s32.totalorder %s31_s14, %s31_s14 }
   0x5   :  { %p908_p0 = scmp.ne.s32.totalorder %s31_s14, %s907_s15  ;;  %p913_p2 = scmp.lt.s32.totalorder %s907_s15, %s907_s15 }
   0x7   :  { %p914_p3 = por %p913_p2, %p912_p1 }
   0x9   :  { %p915_p4 = pnand %p914_p3, %p908_p0 }
   0xb   :  { %918 = shalt.err (!%p915_p4)
}
   0xc   :  { %s966_s16 = smov 128   ;;  %s967_s17 = smov 8  }
   0xd   :  { %36 = dma.hbm_to_vmem [thread:$0]  %s1159_s3, 256, %s31_s14, [#allocation3], %s966_s16, %s966_s16, %s967_s17  }
   0xe   :  { %959 = dma.done.wait [#allocation3], 256  }
   0xf   :  { %960 = vsyncadd [#allocation3], 4294967040  ;;  %v968_v0 = vmov 0   ;;  %vm65_vm0 = vcmask 130048   ;;  %v64_v1 = vld [vmem:[#allocation2 + $0x8] sm:$0xff]  ;;  %v63_v2 = vld [vmem:[#allocation2] sm:$0xff] }
  0x10   :  { %876 = vset.pattern.permute.xlu1 %v968_v0  ;;  %875 = vset.pattern.permute.xlu0 %v968_v0  ;;  %v59_v3 = vld [vmem:[%s1156_s0] sm:$0xff]  ;;  %v60_v4 = vld [vmem:[%s1156_s0 + $0x8] sm:$0xff]  ;;  %v57_v6 = vld [vmem:[%s1158_s2 + $0x10] sm:$0xff]  ;;  %vm199_vm1 = vcmask 261120  }
  0x11   :  { %805 = vmatprep.subr.mxu0 %v64_v1  ;;  %809 = vmatprep.mubr.msk.f32.mxu0 %vm65_vm0, %v59_v3  ;;  %v55_v5 = vld [vmem:[%s1158_s2] sm:$0xff]  ;;  %v61_v7 = vld [vmem:[%s1156_s0 + $0x10] sm:$0xff]  ;;  %v56_v8 = vld [vmem:[%s1158_s2 + $0x8] sm:$0xff] }
  0x12   :  { %806 = vmatpush3.msra.mxu0 %v64_v1  ;;  %165 = vperm.xlu1 %876, %v55_v5   ;;  %v58_v9 = vld [vmem:[%s1158_s2 + $0x18] sm:$0xff]  ;;  %v1063_v11 = vld [vmem:[%s1157_s1] sm:$0xff]   ;;  %v1082_v26 = vld [vmem:[%s1157_s1 + $0x8] sm:$0xff]  }
  0x13   :  { %807 = vmatprep.subr.mxu0 %v63_v2  ;;  %175 = vperm.xlu0 %875, %v57_v6   ;;  %v62_v10 = vld [vmem:[%s1156_s0 + $0x18] sm:$0xff]  ;;  %v276_v28 = vld [vmem:[%s1161_s5 + $0x10] sm:$0xff]  ;;  %v275_v29 = vld [vmem:[%s1161_s5 + $0x8] sm:$0xff] }
  0x14   :  { %808 = vmatpush3.msra.mxu0 %v63_v2  ;;  %819 = vmatprep.mubr.msk.bf16.mxu1 %vm199_vm1, %v1063_v11  ;;  %v277_v27 = vld [vmem:[%s1161_s5 + $0x18] sm:$0xff]  ;;  %v274_v30 = vld [vmem:[%s1161_s5] sm:$0xff]  ;;  %v451_v63 = vld [vmem:[%s1163_s7 + $0x10] sm:$0xff] }
  0x15   :  { %810 = vmatmul.mubr.msk.f32.vlgmr.msra.gmra.mxu0 %vm65_vm0, %v60_v4  ;;  %823 = vmatprep.subr.mxu0 %v277_v27  ;;  %v755_v39 = vld [vmem:[%s1160_s4] ss:$0 sm:$0xff]  ;;  %v452_v62 = vld [vmem:[%s1163_s7 + $0x18] sm:$0xff]  ;;  %v450_v0 = vld [vmem:[%s1163_s7 + $0x8] sm:$0xff] }
  0x16   :  { %812 = vmatprep.mubr.msk.f32.mxu0 %vm65_vm0, %v61_v7  ;;  %170 = vperm.xlu1 %876, %v56_v8   ;;  %v449_v1 = vld [vmem:[%s1163_s7] sm:$0xff] }
  0x17   :  { %180 = vperm.xlu0 %875, %v58_v9   ;;  %824 = vmatpush3.msra.mxu0 %v277_v27 }
  0x18   :  { %825 = vmatprep.subr.mxu0 %v276_v28 }
  0x19   :  { %813 = vmatmul.mubr.msk.f32.gmra.mxu0 %vm65_vm0, %v62_v10  ;;  %v762_v10 = vld [vmem:[%s1162_s6] ss:$0 sm:$0xff] }
  0x1a   :  { %826 = vmatpush3.msra.mxu0 %v276_v28 }
  0x1b   :  { %827 = vmatprep.subr.mxu0 %v275_v29 }
  0x1c   :  { %828 = vmatpush3.msra.mxu0 %v275_v29 }
  0x1d   :  { %829 = vmatprep.subr.mxu0 %v274_v30 }
  0x1e   :  { %830 = vmatpush3.msra.mxu0 %v274_v30 }
  0x1f   :  { %845 = vmatprep.subr.mxu0 %v452_v62 }
  0x8d   :  { %v1067_v12 = vpop.permute.xlu1 %165 }
  0x8e   :  { %v1069_v13 = vpop.permute.xlu0 %175 }
  0x91   :  { %v1071_v17 = vpop.permute.xlu1 %170 }
  0x92   :  { %v1073_v18 = vpop.permute.xlu0 %180 }
  0xd5   :  { %v811_v14 = vpop.f32.mrf.mxu0 }
  0xd6   :  { %v184_v23 = vmul.f32 %v811_v14, %v1071_v17 }
  0xd7   :  { %v144_v15 = vpop.f32.mrf.mxu0 }
  0xd8   :  { %v183_v20 = vmul.f32 %v1067_v12, %v144_v15 }
  0xd9   :  { %v814_v16 = vpop.f32.mrf.mxu0 }
  0xda   :  { %v186_v21 = vmul.f32 %v814_v16, %v1073_v18  ;;  %v187_v25 = vpack.c.bf16 %v184_v23, %v183_v20 }
  0xdb   :  { %v154_v19 = vpop.f32.mrf.mxu0 }
  0xdc   :  { %v185_v22 = vmul.f32 %v1069_v13, %v154_v19 }
  0xde   :  { %v188_v24 = vpack.c.bf16 %v186_v21, %v185_v22 }
  0xe0   :  { %815 = vmatprep.subr.bf16.mxu1 %v188_v24 }
  0xe1   :  { %816 = vmatpush3.bf16.msra.mxu1 %v188_v24 }
  0xe2   :  { %817 = vmatprep.subr.bf16.mxu1 %v187_v25 }
  0xe5   :  { %818 = vmatpush3.bf16.msra.mxu1 %v187_v25 }
  0xe8   :  { %820 = vmatmul.mubr.msk.bf16.vlgmr.msra.gmra.mxu1 %vm199_vm1, %v1082_v26 }
  0xe9   :  { %841 = vmatprep.mubr.msk.bf16.mxu1 %vm199_vm1, %v1063_v11 }
 0x1a8   :  { %v821_v31 = vpop.f32.mrf.mxu1 }
 0x1a9   :  { %v249_v32 = vadd.f32 %v821_v31, %v185_v22 }
 0x1aa   :  { %v240_v33 = vpop.f32.mrf.mxu1 }
 0x1ab   :  { %v241_v34 = vadd.f32 %v240_v33, %v183_v20  ;;  %v257_v38 = vmul.f32 %v249_v32, %v1069_v13 }
 0x1ac   :  { %v822_v35 = vpop.f32.mrf.mxu1 }
 0x1ad   :  { %v255_v36 = vmul.f32 %v241_v34, %v1067_v12  ;;  %v252_v37 = vadd.f32 %v822_v35, %v186_v21  ;;  %v268_v46 = vadd.f32 %v755_v39, %v257_v38 }
 0x1ae   :  { %v243_v40 = vpop.f32.mrf.mxu1 }
 0x1af   :  { %v266_v41 = vadd.f32 %v755_v39, %v255_v36  ;;  %v244_v42 = vadd.f32 %v243_v40, %v184_v23  ;;  %v258_v44 = vmul.f32 %v252_v37, %v1073_v18  ;;  %v272_v50 = vmax.f32 %v268_v46, 0.0 }
 0x1b1   :  { %v270_v43 = vmax.f32 %v266_v41, 0.0  ;;  %v256_v45 = vmul.f32 %v244_v42, %v1071_v17  ;;  %v269_v48 = vadd.f32 %v755_v39, %v258_v44 }
 0x1b3   :  { %v267_v47 = vadd.f32 %v755_v39, %v256_v45  ;;  %831 = vmatprep.mubr.msk.f32.mxu0 %vm199_vm1, %v270_v43  ;;  %v273_v51 = vmax.f32 %v269_v48, 0.0 }
 0x1b5   :  { %v271_v49 = vmax.f32 %v267_v47, 0.0 }
 0x1b7   :  { %832 = vmatmul.mubr.msk.f32.vlgmr.msra.gmra.mxu0 %vm199_vm1, %v271_v49 }
 0x1b8   :  { %834 = vmatprep.mubr.msk.f32.mxu0 %vm199_vm1, %v272_v50  ;;  %846 = vmatpush3.msra.mxu0 %v452_v62 }
 0x1b9   :  { %847 = vmatprep.subr.mxu0 %v451_v63 }
 0x1ba   :  { %848 = vmatpush3.msra.mxu0 %v451_v63 }
 0x1bb   :  { %835 = vmatmul.mubr.msk.f32.gmra.mxu0 %vm199_vm1, %v273_v51  ;;  %849 = vmatprep.subr.mxu0 %v450_v0 }
 0x1bc   :  { %850 = vmatpush3.msra.mxu0 %v450_v0 }
 0x1bd   :  { %851 = vmatprep.subr.mxu0 %v449_v1 }
 0x1be   :  { %852 = vmatpush3.msra.mxu0 %v449_v1 }
 0x277   :  { %v833_v52 = vpop.f32.mrf.mxu0 }
 0x278   :  { %v376_v59 = vmul.f32 %v833_v52, %v1071_v17 }
 0x279   :  { %v356_v53 = vpop.f32.mrf.mxu0 }
 0x27a   :  { %v375_v56 = vmul.f32 %v356_v53, %v1067_v12 }
 0x27b   :  { %v836_v54 = vpop.f32.mrf.mxu0 }
 0x27c   :  { %v378_v57 = vmul.f32 %v836_v54, %v1073_v18  ;;  %v379_v61 = vpack.c.bf16 %v376_v59, %v375_v56 }
 0x27d   :  { %v366_v55 = vpop.f32.mrf.mxu0 }
 0x27e   :  { %v377_v58 = vmul.f32 %v366_v55, %v1069_v13 }
 0x280   :  { %v380_v60 = vpack.c.bf16 %v378_v57, %v377_v58 }
 0x282   :  { %837 = vmatprep.subr.bf16.mxu1 %v380_v60 }
 0x283   :  { %838 = vmatpush3.bf16.msra.mxu1 %v380_v60 }
 0x284   :  { %839 = vmatprep.subr.bf16.mxu1 %v379_v61 }
 0x287   :  { %840 = vmatpush3.bf16.msra.mxu1 %v379_v61 }
 0x28a   :  { %842 = vmatmul.mubr.msk.bf16.vlgmr.msra.gmra.mxu1 %vm199_vm1, %v1082_v26 }
 0x28b   :  { %863 = vmatprep.mubr.msk.bf16.mxu1 %vm199_vm1, %v1063_v11 }
 0x34a   :  { %v843_v2 = vpop.f32.mrf.mxu1 }
 0x34b   :  { %v424_v3 = vadd.f32 %v843_v2, %v377_v58 }
 0x34c   :  { %v415_v4 = vpop.f32.mrf.mxu1 }
 0x34d   :  { %v416_v5 = vadd.f32 %v415_v4, %v375_v56  ;;  %v432_v9 = vmul.f32 %v424_v3, %v1069_v13 }
 0x34e   :  { %v844_v6 = vpop.f32.mrf.mxu1 }
 0x34f   :  { %v430_v7 = vmul.f32 %v416_v5, %v1067_v12  ;;  %v427_v8 = vadd.f32 %v844_v6, %v378_v57  ;;  %v443_v21 = vadd.f32 %v762_v10, %v432_v9 }
 0x350   :  { %v418_v11 = vpop.f32.mrf.mxu1 }
 0x351   :  { %v441_v14 = vadd.f32 %v762_v10, %v430_v7  ;;  %v419_v15 = vadd.f32 %v418_v11, %v376_v59  ;;  %v433_v19 = vmul.f32 %v427_v8, %v1073_v18  ;;  %v447_v24 = vmax.f32 %v443_v21, 0.0  ;;  %v763_v18 = vld [vmem:[%s1164_s8] ss:$0 sm:$0xff]  ;;  %s969_s8 = smov [#allocation5]  }
 0x352   :  { %s721_s15 = sshll.u32 %s969_s8, 4  ;;  %s722_s15 = int_to_ptr.vmem [resolvable:$true] %s721_s15 }
 0x353   :  { %v445_v16 = vmax.f32 %v441_v14, 0.0  ;;  %v431_v20 = vmul.f32 %v419_v15, %v1071_v17  ;;  %v444_v12 = vadd.f32 %v762_v10, %v433_v19  ;;  %s919_s18 = scalar_lea.vmem %s722_s15, 512  ;;  %p924_p6 = scmp.lt.s32.totalorder %s722_s15, %s722_s15 }
 0x354   :  { %p920_p5 = scmp.ne.s32.totalorder %s722_s15, %s919_s18  ;;  %p925_p7 = scmp.lt.s32.totalorder %s919_s18, %s919_s18 }
 0x355   :  { %v442_v22 = vadd.f32 %v762_v10, %v431_v20  ;;  %853 = vmatprep.mubr.msk.f32.mxu0 %vm199_vm1, %v445_v16  ;;  %v448_v13 = vmax.f32 %v444_v12, 0.0 }
 0x356   :  { %p926_p8 = por %p925_p7, %p924_p6 }
 0x357   :  { %v446_v23 = vmax.f32 %v442_v22, 0.0 }
 0x358   :  { %p927_p9 = pnand %p926_p8, %p920_p5 }
 0x359   :  { %854 = vmatmul.mubr.msk.f32.vlgmr.msra.gmra.mxu0 %vm199_vm1, %v446_v23 }
 0x35a   :  { %856 = vmatprep.mubr.msk.f32.mxu0 %vm199_vm1, %v447_v24 }
 0x35d   :  { %857 = vmatmul.mubr.msk.f32.gmra.mxu0 %vm199_vm1, %v448_v13 }
 0x419   :  { %v855_v25 = vpop.f32.mrf.mxu0 }
 0x41a   :  { %v544_v32 = vadd.f32 %v855_v25, %v763_v18 }
 0x41b   :  { %v538_v17 = vpop.f32.mrf.mxu0 }
 0x41c   :  { %v539_v27 = vadd.f32 %v763_v18, %v538_v17 }
 0x41d   :  { %v858_v28 = vpop.f32.mrf.mxu0 }
 0x41e   :  { %v554_v29 = vadd.f32 %v858_v28, %v763_v18  ;;  %557 = vmax.xlane.f32.xlu0 %v539_v27 }
 0x41f   :  { %v548_v30 = vpop.f32.mrf.mxu0 }
 0x420   :  { %v549_v31 = vadd.f32 %v763_v18, %v548_v30  ;;  %563 = vmax.xlane.f32.xlu1 %v554_v29 }
 0x422   :  { %561 = vmax.xlane.f32.xlu0 %v549_v31 }
 0x426   :  { %559 = vmax.xlane.f32.xlu0 %v544_v32 }
 0x4a7   :  { %v558_v33 = vpop.xlane.xlu0 %557 }
 0x4a8   :  { %v565_v36 = vsub.f32 %v539_v27, %v558_v33 }
 0x4a9   :  { %v564_v34 = vpop.xlane.xlu1 %563 }
 0x4aa   :  { %v568_v35 = vsub.f32 %v554_v29, %v564_v34  ;;  %v569_v41 = vmul.f32 1.442695, %v565_v36 }
 0x4ab   :  { %v562_v37 = vpop.xlane.xlu0 %561 }
 0x4ac   :  { %v575_v38 = vmul.f32 1.442695, %v568_v35  ;;  %v567_v39 = vsub.f32 %v549_v31, %v562_v37 }
 0x4ae   :  { %879 = vpow2.f32 %v575_v38  ;;  %v573_v40 = vmul.f32 1.442695, %v567_v39 }
 0x4af   :  { %v560_v42 = vpop.xlane.xlu0 %559 }
 0x4b0   :  { %881 = vpow2.f32 %v573_v40  ;;  %v566_v43 = vsub.f32 %v544_v32, %v560_v42 }
 0x4b1   :  { %883 = vpow2.f32 %v569_v41 }
 0x4b2   :  { %v571_v44 = vmul.f32 1.442695, %v566_v43 }
 0x4b4   :  { %885 = vpow2.f32 %v571_v44 }
 0x4bb   :  { %v880_v45 = vpop.eup %879 }
 0x4bc   :  { %583 = vadd.xlane.f32.xlu0 %v880_v45 }
 0x4bd   :  { %v882_v46 = vpop.eup %881 }
 0x4be   :  { %581 = vadd.xlane.f32.xlu1 %v882_v46  ;;  %v884_v47 = vpop.eup %883 }
 0x4c1   :  { %v886_v48 = vpop.eup %885 }
 0x4c2   :  { %577 = vadd.xlane.f32.xlu1 %v884_v47  ;;  %579 = vadd.xlane.f32.xlu0 %v886_v48 }
 0x545   :  { %v584_v49 = vpop.xlane.xlu0 %583 }
 0x546   :  { %887 = vrcp.f32 %v584_v49 }
 0x547   :  { %v582_v50 = vpop.xlane.xlu1 %581 }
 0x548   :  { %889 = vrcp.f32 %v582_v50 }
 0x54b   :  { %v578_v51 = vpop.xlane.xlu1 %577  ;;  %v580_v52 = vpop.xlane.xlu0 %579 }
 0x54c   :  { %891 = vrcp.f32 %v578_v51 }
 0x54d   :  { %893 = vrcp.f32 %v580_v52 }
 0x553   :  { %v888_v53 = vpop.eup %887 }
 0x554   :  { %v592_v54 = vmul.f32 %v888_v53, %v880_v45 }
 0x555   :  { %v890_v55 = vpop.eup %889 }
 0x556   :  { %v590_v56 = vmul.f32 %v890_v55, %v882_v46  ;;  %596 = vst [vmem:[#allocation5 + $0x18] sm:$0xff] %v592_v54 }
 0x558   :  { %v598_v57 = vpack.c.bf16 %v592_v54, %v590_v56  ;;  %595 = vst [vmem:[#allocation5 + $0x10] sm:$0xff] %v590_v56 }
 0x559   :  { %v892_v58 = vpop.eup %891 }
 0x55a   :  { %v894_v59 = vpop.eup %893  ;;  %859 = vmatprep.subr.bf16.mxu1 %v598_v57  ;;  %v586_v60 = vmul.f32 %v892_v58, %v884_v47 }
 0x55b   :  { %860 = vmatpush3.bf16.msra.mxu1 %v598_v57  ;;  %v588_v61 = vmul.f32 %v894_v59, %v886_v48 }
 0x55c   :  { %593 = vst [vmem:[#allocation5] sm:$0xff] %v586_v60 }
 0x55d   :  { %v597_v62 = vpack.c.bf16 %v588_v61, %v586_v60  ;;  %594 = vst [vmem:[#allocation5 + $0x8] sm:$0xff] %v588_v61  ;;  %v689_v63 = vadd.f32 %v588_v61, %v586_v60 }
 0x55f   :  { %861 = vmatprep.subr.bf16.mxu1 %v597_v62  ;;  %v690_v0 = vadd.f32 %v689_v63, %v590_v56 }
 0x560   :  { %862 = vmatpush3.bf16.msra.mxu1 %v597_v62 }
 0x561   :  { %v691_v1 = vadd.f32 %v690_v0, %v592_v54 }
 0x563   :  { %864 = vmatmul.mubr.msk.bf16.vlgmr.msra.gmra.mxu1 %vm199_vm1, %v1082_v26  ;;  %v692_v2 = vrot.slane %v691_v1, 4 }
 0x565   :  { %v693_v3 = vadd.f32 %v692_v2, %v691_v1 }
 0x567   :  { %v694_v5 = vrot.slane %v693_v3, 2 }
 0x569   :  { %v695_v8 = vadd.f32 %v694_v5, %v693_v3 }
 0x56b   :  { %v696_v20 = vrot.slane %v695_v8, 1 }
 0x56d   :  { %v697_v24 = vadd.f32 %v696_v20, %v695_v8 }
 0x56f   :  { %v698_v25 = vmul.f32 %v697_v24, %v697_v24 }
 0x623   :  { %v865_v4 = vpop.f32.mrf.mxu1 }
 0x624   :  { %v650_v15 = vmul.f32 %v865_v4, %v590_v56 }
 0x625   :  { %v633_v6 = vpop.f32.mrf.mxu1 }
 0x626   :  { %v648_v10 = vmul.f32 %v633_v6, %v586_v60 }
 0x627   :  { %v866_v7 = vpop.f32.mrf.mxu1 }
 0x628   :  { %v651_v21 = vmul.f32 %v866_v7, %v592_v54 }
 0x629   :  { %v636_v9 = vpop.f32.mrf.mxu1 }
 0x62a   :  { %v649_v11 = vmul.f32 %v636_v9, %v588_v61  ;;  %v665_v14 = vadd.f32 %v636_v9, %v633_v6 }
 0x62c   :  { %v652_v16 = vadd.f32 %v649_v11, %v648_v10  ;;  %v666_v19 = vadd.f32 %v865_v4, %v665_v14 }
 0x62e   :  { %v667_v26 = vadd.f32 %v866_v7, %v666_v19  ;;  %v653_v22 = vadd.f32 %v652_v16, %v650_v15 }
 0x630   :  { %v668_v12 = vrot.slane %v667_v26, 4  ;;  %v654_v23 = vadd.f32 %v653_v22, %v651_v21 }
 0x632   :  { %655 = vadd.xlane.f32.xlu1 %v654_v23  ;;  %v669_v13 = vadd.f32 %v668_v12, %v667_v26 }
 0x634   :  { %v670_v18 = vrot.slane %v669_v13, 2 }
 0x636   :  { %699 = vadd.xlane.f32.xlu1 %v698_v25  ;;  %v671_v17 = vadd.f32 %v670_v18, %v669_v13 }
 0x638   :  { %v672_v27 = vrot.slane %v671_v17, 1 }
 0x63a   :  { %v673_v28 = vadd.f32 %v672_v27, %v671_v17 }
 0x63c   :  { %v674_v29 = vmul.f32 2.0, %v673_v28 }
 0x63e   :  { %675 = vadd.xlane.f32.xlu0 %v674_v29  ;;  %v680_v30 = vmul.f32 %v674_v29, %v674_v29 }
 0x642   :  { %681 = vadd.xlane.f32.xlu0 %v680_v30 }
 0x643   :  { %930 = shalt.err (!%p927_p9)
}
 0x644   :  { %727 = dma.vmem_to_hbm [thread:$0]  %s722_s15, 512, %s1165_s9, [#allocation4], %s966_s16, %s966_s16, %s967_s17   ;;  %v710_v48 = vlaneseq  ;;  %vm714_vm6 = vcmask 8192  }
 0x645   :  { %s970_s16 = smov [#allocation6]  }
 0x646   :  { %v711_v53 = vand.u32 127, %v710_v48  ;;  %s734_s17 = sshll.u32 %s970_s16, 4  ;;  %s735_s17 = int_to_ptr.vmem [resolvable:$true] %s734_s17 }
 0x647   :  { %s939_s19 = scalar_lea.vmem %s735_s17, 16  ;;  %s943_s20 = scalar_lea.vmem %s735_s17, 32 }
 0x648   :  { %vm712_vm5 = vcmp.eq.s32.totalorder %v711_v53, 0  ;;  %p940_p10 = scmp.ne.s32.totalorder %s735_s17, %s939_s19  ;;  %p944_p11 = scmp.lt.s32.totalorder %s735_s17, %s735_s17 }
 0x649   :  { %p945_p12 = scmp.lt.s32.totalorder %s943_s20, %s939_s19 }
 0x64b   :  { %p946_p13 = por %p945_p12, %p944_p11 }
 0x64d   :  { %p947_p0 = pnand %p946_p13, %p940_p10 }
 0x6bb   :  { %v656_v31 = vpop.xlane.xlu1 %655 }
 0x6bc   :  { %v657_v32 = vrot.slane %v656_v31, 4 }
 0x6be   :  { %v658_v33 = vadd.f32 %v657_v32, %v656_v31 }
 0x6bf   :  { %v700_v40 = vpop.xlane.xlu1 %699 }
 0x6c0   :  { %v659_v34 = vrot.slane %v658_v33, 2  ;;  %895 = vrsqrt.f32 %v700_v40  ;;  %vm703_vm3 = vcmp.eq.f32.partialorder %v700_v40, inf  ;;  %v706_v47 = vand.u32 2147483648, %v700_v40 }
 0x6c1   :  { %vm705_vm4 = vcmp.eq.f32.partialorder %v700_v40, 0.0 }
 0x6c2   :  { %v660_v35 = vadd.f32 %v659_v34, %v658_v33 }
 0x6c4   :  { %v661_v36 = vrot.slane %v660_v35, 1 }
 0x6c6   :  { %v662_v37 = vadd.f32 %v661_v36, %v660_v35 }
 0x6c7   :  { %v676_v38 = vpop.xlane.xlu0 %675 }
 0x6c8   :  { %867 = vpush %v662_v37  ;;  %v677_v39 = vmul.f32 0.5, %v676_v38 }
 0x6ca   :  { %vm678_vm2 = vcmp.gt.f32.partialorder %v677_v39, 0.0 }
 0x6cb   :  { %v679_v41 = vsel %vm678_vm2, %v677_v39, 1.0  ;;  %v682_v49 = vpop.xlane.xlu0 %681 }
 0x6cc   :  { %v683_v42 = vmul.f32 2.0, %v679_v41 }
 0x6cd   :  { %v896_v43 = vpop.eup %895 }
 0x6ce   :  { %897 = vrcp.f32 %v683_v42  ;;  %v702_v44 = vmul.f32 %v896_v43, %v700_v40 }
 0x6d0   :  { %v704_v45 = vsel %vm703_vm3, %v700_v40, %v702_v44 }
 0x6d1   :  { %v707_v50 = vsel %vm705_vm4, %v706_v47, %v704_v45 }
 0x6d2   :  { %v708_v55 = vmul.f32 0.0625, %v707_v50 }
 0x6d4   :  { %v770_v58 = vadd.f32 -1.0, %v708_v55 }
 0x6db   :  { %v898_v46 = vpop.eup %897 }
 0x6dc   :  { %v685_v51 = vmul.f32 %v898_v46, %v682_v49 }
 0x6f9   :  { %s868_s9 = spop %867 }
 0x6fa   :  { %v664_v52 = vstv %s868_s9 }
 0x6fb   :  { %v686_v54 = vsub.f32 %v664_v52, %v685_v51 }
 0x6fd   :  { %v687_v56 = vsub.f32 0.0, %v686_v54 }
 0x6ff   :  { %v688_v57 = vmul.f32 %v898_v46, %v687_v56 }
 0x701   :  { %v713_v59 = vsel %vm712_vm5, %v688_v57, %v770_v58 }
 0x702   :  { %715 = vst.msk [vmem:[#allocation6] sm:$0x1] %vm714_vm6, %v713_v59 }
 0x703   :  { %950 = shalt.err (!%p947_p0)
}
 0x704   :  { %737 = dma.vmem_to_hbm [thread:$0]  %s735_s17, 16, %s1166_s10, [#allocation7]  }
 0x705   :  { %961 = dma.done.wait [#allocation4], 512  }
 0x706   :  { %962 = vsyncadd [#allocation4], 4294966784 }
 0x707   :  { %963 = dma.done.wait [#allocation7], 16  }
 0x708   :  { %964 = vsyncadd [#allocation7], 4294967280 }
 0x709   :  { %744 = vsyncpa [#allocation3], 1 }
 0x70a   :  { %745 = vsyncpa [#allocation4], 1 }
 0x70b   :  { %746 = vsyncpa [#allocation7], 1 }

</bundles_post_ra>
